<compile_context>
chip_gen: v5e
topology: v5e:2x2
jax: 0.10.0
libtpu: 0.0.40
codegen_flags: <defaults>
</compile_context>

<pallas_src>
import functools

import jax
import jax.numpy as jnp
from jax.experimental import pallas as pl
from jax.experimental.pallas import tpu as pltpu

SLOPE = 0.01  # torch.nn.LeakyReLU default negative_slope


def _round_up(x: int, m: int) -> int:
    return ((x + m - 1) // m) * m


def _choose_batch_tile(batch: int):
    """Pick a batch tile: prefer big tiles (MXU M-fill) but cap padding waste
    at ~12.5%; guarantee >=2 grid steps when possible (v7x dual TensorCore)."""
    best_tb = 8
    best_pad = _round_up(batch, 8)
    for tb in (16, 32, 64, 128, 256):
        b_pad = _round_up(batch, tb)
        if (b_pad - batch) * 8 <= b_pad:  # <= 12.5% padded rows
            best_tb, best_pad = tb, b_pad
    if best_pad // best_tb == 1 and best_tb > 8:
        best_tb //= 2  # let the parallel batch axis shard across 2 TCs on v7x
    return best_tb, best_pad


def _mlp_kernel(*refs, n_hidden: int, slope: float):
    """Fused MLP forward for one batch tile.

    refs (n_hidden > 0):
      x [TB, IN_pad] f32, w_in [IN_pad, H_pad] bf16, b_in [1, H_pad] f32,
      w_hid [n_hidden, H_pad, H_pad] bf16, b_hid [n_hidden, 1, H_pad] f32,
      w_out [H_pad, OUT_pad] bf16, b_out [1, OUT_pad] f32, o [TB, OUT_pad] f32
    refs (n_hidden == 0): same without w_hid/b_hid.
    """
    if n_hidden > 0:
        (x_ref, w_in_ref, b_in_ref, w_hid_ref, b_hid_ref,
         w_out_ref, b_out_ref, o_ref) = refs
    else:
        x_ref, w_in_ref, b_in_ref, w_out_ref, b_out_ref, o_ref = refs
        w_hid_ref = b_hid_ref = None

    # Input layer: Linear (bf16 MXU, f32 accumulate) + LeakyReLU (f32 VPU).
    y = jnp.dot(x_ref[...].astype(jnp.bfloat16), w_in_ref[...],
                preferred_element_type=jnp.float32)
    y = y + b_in_ref[...]
    h = jnp.maximum(y, slope * y)

    # Hidden layers: static unroll, activation stays in vregs between layers.
    for l in range(n_hidden):
        y = jnp.dot(h.astype(jnp.bfloat16), w_hid_ref[l],
                    preferred_element_type=jnp.float32)
        y = y + b_hid_ref[l]
        h = jnp.maximum(y, slope * y)

    # Output layer: Linear + Sigmoid (exp on EUP, approx reciprocal on EUP).
    y = jnp.dot(h.astype(jnp.bfloat16), w_out_ref[...],
                preferred_element_type=jnp.float32)
    y = y + b_out_ref[...]
    o_ref[...] = pl.reciprocal(1.0 + jnp.exp(-y), approx=True).astype(o_ref.dtype)


def init_params(key, input_size, output_size, hidden_size, n_hidden_layers):
    """Deterministic parameter init mirroring the module's layer shapes.

    Returns list of (W[in, out], b[out]) f32 for each Linear layer in order.
    """
    sizes = [(input_size, hidden_size)]
    sizes += [(hidden_size, hidden_size)] * n_hidden_layers
    sizes += [(hidden_size, output_size)]
    params = []
    for (fin, fout) in sizes:
        key, kw, kb = jax.random.split(key, 3)
        bound = 1.0 / jnp.sqrt(fin)  # PyTorch Linear default init scale
        w = jax.random.uniform(kw, (fin, fout), jnp.float32, -bound, bound)
        b = jax.random.uniform(kb, (fout,), jnp.float32, -bound, bound)
        params.append((w, b))
    return params


def prepare_padded_params(params):
    """One-time padding / stacking of the weights (hoisted out of the forward
    path).  Weights become bf16 lane/sublane-aligned slabs, biases stay f32."""
    input_size = params[0][0].shape[0]
    hidden_size = params[0][0].shape[1]
    output_size = params[-1][0].shape[1]
    n_hidden = len(params) - 2

    in_pad = _round_up(input_size, 128)
    hid_pad = _round_up(hidden_size, 128)
    out_pad = _round_up(output_size, 128)

    def pad_w(w, rows, cols):
        return (jnp.zeros((rows, cols), jnp.bfloat16)
                .at[:w.shape[0], :w.shape[1]].set(w.astype(jnp.bfloat16)))

    def pad_b(b, cols):
        return (jnp.zeros((1, cols), jnp.float32)
                .at[0, :b.shape[0]].set(b.astype(jnp.float32)))

    w0, b0 = params[0]
    wl, bl = params[-1]
    packed = {
        "w_in": pad_w(w0, in_pad, hid_pad), "b_in": pad_b(b0, hid_pad),
        "w_out": pad_w(wl, hid_pad, out_pad), "b_out": pad_b(bl, out_pad),
        "w_hid": None, "b_hid": None,
        "input_size": input_size, "hidden_size": hidden_size,
        "output_size": output_size, "n_hidden": n_hidden,
    }
    if n_hidden > 0:
        packed["w_hid"] = jnp.stack(
            [pad_w(w, hid_pad, hid_pad) for (w, _) in params[1:-1]])
        packed["b_hid"] = jnp.stack(
            [pad_b(b, hid_pad) for (_, b) in params[1:-1]])
    return packed


def _call(x_pad, packed, *, tb, b_pad, in_pad, hid_pad, out_pad, n_hidden,
          single_buffer_weights):
    def wspec(shape, index_map):
        # Weights have constant index_maps; a second pipeline buffer is waste.
        if single_buffer_weights:
            return pl.BlockSpec(shape, index_map, pipeline_mode=pl.Buffered(1))
        return pl.BlockSpec(shape, index_map)

    in_specs = [
        pl.BlockSpec((tb, in_pad), lambda i: (i, 0)),         # x: batch-tiled
        wspec((in_pad, hid_pad), lambda i: (0, 0)),
        wspec((1, hid_pad), lambda i: (0, 0)),
    ]
    operands = [x_pad, packed["w_in"], packed["b_in"]]
    if n_hidden > 0:
        # TODO(synk): for very deep/wide stacks (n_hidden*H_pad^2*2B > ~VMEM/3),
        # stream w_hid per layer from pl.ANY HBM with pltpu.make_async_copy
        # double-buffering instead of residing the full stack in VMEM.
        in_specs += [
            wspec((n_hidden, hid_pad, hid_pad), lambda i: (0, 0, 0)),
            wspec((n_hidden, 1, hid_pad), lambda i: (0, 0, 0)),
        ]
        operands += [packed["w_hid"], packed["b_hid"]]
    in_specs += [
        wspec((hid_pad, out_pad), lambda i: (0, 0)),
        wspec((1, out_pad), lambda i: (0, 0)),
    ]
    operands += [packed["w_out"], packed["b_out"]]

    # Explicit VMEM budget: weights (single/double-buffered) + double-buffered
    # activation tiles, with headroom; clamp to v7x's 64 MiB physical VMEM.
    w_buf = 1 if single_buffer_weights else 2
    weight_bytes = (in_pad * hid_pad + n_hidden * hid_pad * hid_pad
                    + hid_pad * out_pad) * 2                      # bf16
    bias_bytes = ((1 + n_hidden) * hid_pad + out_pad) * 4         # f32
    act_bytes = 2 * tb * (in_pad + out_pad) * 4                   # f32, 2 bufs
    vmem_needed = w_buf * (weight_bytes + bias_bytes) + act_bytes
    vmem_limit = int(min(64 << 20, max(2 * vmem_needed + (8 << 20), 32 << 20)))

    flops = 2 * b_pad * (in_pad * hid_pad + n_hidden * hid_pad * hid_pad
                         + hid_pad * out_pad)
    cost = pl.CostEstimate(
        flops=flops,
        transcendentals=b_pad * out_pad,
        bytes_accessed=(x_pad.size * 4 + weight_bytes + bias_bytes
                        + b_pad * out_pad * 4))

    kernel = functools.partial(_mlp_kernel, n_hidden=n_hidden, slope=SLOPE)
    return pl.pallas_call(
        kernel,
        out_shape=jax.ShapeDtypeStruct((b_pad, out_pad), jnp.float32),
        grid_spec=pltpu.PrefetchScalarGridSpec(
            num_scalar_prefetch=0,
            grid=(b_pad // tb,),
            in_specs=in_specs,
            out_specs=pl.BlockSpec((tb, out_pad), lambda i: (i, 0)),
        ),
        compiler_params=pltpu.CompilerParams(
            dimension_semantics=("parallel",),
            vmem_limit_bytes=vmem_limit),
        cost_estimate=cost,
    )(*operands)


def fully_connected_forward(x, packed):
    """Forward pass of the whole MLP as a single fused Pallas kernel."""
    B, input_size = x.shape
    assert input_size == packed["input_size"]
    output_size = packed["output_size"]
    n_hidden = packed["n_hidden"]
    in_pad, hid_pad = packed["w_in"].shape
    out_pad = packed["w_out"].shape[1]

    tb, b_pad = _choose_batch_tile(B)
    x_pad = (jnp.zeros((b_pad, in_pad), jnp.float32)
             .at[:B, :input_size].set(x.astype(jnp.float32)))

    kwargs = dict(tb=tb, b_pad=b_pad, in_pad=in_pad, hid_pad=hid_pad,
                  out_pad=out_pad, n_hidden=n_hidden)
    try:
        out = _call(x_pad, packed, single_buffer_weights=True, **kwargs)
    except Exception:
        # pipeline_mode=pl.Buffered(1) unsupported on this jax build; fall back
        # to the default double-buffered weight specs (correctness-identical).
        out = _call(x_pad, packed, single_buffer_weights=False, **kwargs)
    return out[:B, :output_size]


def reference_forward(x, params):
    """Pure-JAX f32 reference for sanity checking."""
    h = x
    for i, (w, b) in enumerate(params):
        y = h @ w + b
        if i == len(params) - 1:
            h = jax.nn.sigmoid(y)
        else:
            h = jnp.where(y > 0, y, SLOPE * y)
    return h


if __name__ == "__main__":
    input_size = 16
    hidden_size = 32
    output_size = 8
    n_hidden_layers = 2
    batch = 2

    key = jax.random.PRNGKey(0)
    key, kx = jax.random.split(key)
    x = jax.random.normal(kx, (batch, input_size), jnp.float32)

    params = init_params(key, input_size, output_size, hidden_size,
                         n_hidden_layers)
    packed = prepare_padded_params(params)   # padded/stacked once, reused

    out = fully_connected_forward(x, packed)
    out = jax.block_until_ready(out)

    ref = reference_forward(x, params)
    assert out.shape == (batch, output_size)
    # bf16 matmul operands (f32 accumulate) + approx reciprocal in sigmoid:
    # ~1e-2-level agreement with the pure-f32 reference is expected.
    assert jnp.allclose(out, ref, atol=2e-2, rtol=2e-2)

    print("KERNEL_OK")
</pallas_src>

<mosaic_0001>
module attributes {stable_mosaic.version = 11 : i64} {
  func.func @_mlp_kernel(%arg0: i32, %arg1: memref<8x128xf32, #tpu.memory_space<vmem>>, %arg2: memref<128x128xbf16, #tpu.memory_space<vmem>>, %arg3: memref<1x128xf32, #tpu.memory_space<vmem>>, %arg4: memref<2x128x128xbf16, #tpu.memory_space<vmem>>, %arg5: memref<2x1x128xf32, #tpu.memory_space<vmem>>, %arg6: memref<128x128xbf16, #tpu.memory_space<vmem>>, %arg7: memref<1x128xf32, #tpu.memory_space<vmem>>, %arg8: memref<8x128xf32, #tpu.memory_space<vmem>>) attributes {dimension_semantics = [#tpu.dimension_semantics<parallel>], iteration_bounds = array<i64: 1>, scalar_prefetch = 0 : i64, scratch_operands = 0 : i64, tpu.core_type = #tpu.core_type<tc>, window_params = [{transform_indices = @transform_0, window_bounds = array<i64: 8, 128>}, {pipeline_mode = #tpu.pipeline_mode<synchronous>, transform_indices = @transform_1, window_bounds = array<i64: 128, 128>}, {pipeline_mode = #tpu.pipeline_mode<synchronous>, transform_indices = @transform_2, window_bounds = array<i64: 1, 128>}, {pipeline_mode = #tpu.pipeline_mode<synchronous>, transform_indices = @transform_3, window_bounds = array<i64: 2, 128, 128>}, {pipeline_mode = #tpu.pipeline_mode<synchronous>, transform_indices = @transform_4, window_bounds = array<i64: 2, 1, 128>}, {pipeline_mode = #tpu.pipeline_mode<synchronous>, transform_indices = @transform_5, window_bounds = array<i64: 128, 128>}, {pipeline_mode = #tpu.pipeline_mode<synchronous>, transform_indices = @transform_6, window_bounds = array<i64: 1, 128>}, {transform_indices = @transform_7, window_bounds = array<i64: 8, 128>}]} {
    %c0 = arith.constant 0 : index
    %c0_0 = arith.constant 0 : index
    %0 = vector.load %arg1[%c0, %c0_0] : memref<8x128xf32, #tpu.memory_space<vmem>>, vector<8x128xf32>
    %1 = arith.truncf %0 : vector<8x128xf32> to vector<8x128xbf16>
    %c0_1 = arith.constant 0 : index
    %c0_2 = arith.constant 0 : index
    %2 = vector.load %arg2[%c0_1, %c0_2] : memref<128x128xbf16, #tpu.memory_space<vmem>>, vector<128x128xbf16>
    %cst = arith.constant dense<0.000000e+00> : vector<8x128xf32>
    %3 = tpu.matmul %1, %2, %cst {dimension_numbers = #tpu.dot_dimension_numbers<[1], [0], [0], [1], [0, 0, 1, 1], [], []>} : vector<8x128xbf16>, vector<128x128xbf16>, vector<8x128xf32> -> vector<8x128xf32>
    %c0_3 = arith.constant 0 : index
    %c0_4 = arith.constant 0 : index
    %4 = vector.load %arg3[%c0_3, %c0_4] : memref<1x128xf32, #tpu.memory_space<vmem>>, vector<1x128xf32>
    %5 = vector.broadcast %4 : vector<1x128xf32> to vector<8x128xf32>
    %6 = arith.addf %3, %5 : vector<8x128xf32>
    %cst_5 = arith.constant 0.00999999977 : f32
    %7 = vector.broadcast %cst_5 : f32 to vector<8x128xf32>
    %8 = arith.mulf %7, %6 : vector<8x128xf32>
    %9 = arith.maximumf %6, %8 : vector<8x128xf32>
    %10 = arith.truncf %9 : vector<8x128xf32> to vector<8x128xbf16>
    %c0_6 = arith.constant 0 : index
    %c0_7 = arith.constant 0 : index
    %c0_8 = arith.constant 0 : index
    %11 = vector.load %arg4[%c0_6, %c0_7, %c0_8] : memref<2x128x128xbf16, #tpu.memory_space<vmem>>, vector<1x128x128xbf16>
    %12 = vector.shape_cast %11 : vector<1x128x128xbf16> to vector<128x128xbf16>
    %cst_9 = arith.constant dense<0.000000e+00> : vector<8x128xf32>
    %13 = tpu.matmul %10, %12, %cst_9 {dimension_numbers = #tpu.dot_dimension_numbers<[1], [0], [0], [1], [0, 0, 1, 1], [], []>} : vector<8x128xbf16>, vector<128x128xbf16>, vector<8x128xf32> -> vector<8x128xf32>
    %c0_10 = arith.constant 0 : index
    %c0_11 = arith.constant 0 : index
    %c0_12 = arith.constant 0 : index
    %14 = vector.load %arg5[%c0_10, %c0_11, %c0_12] : memref<2x1x128xf32, #tpu.memory_space<vmem>>, vector<1x1x128xf32>
    %15 = vector.shape_cast %14 : vector<1x1x128xf32> to vector<1x128xf32>
    %16 = vector.broadcast %15 : vector<1x128xf32> to vector<8x128xf32>
    %17 = arith.addf %13, %16 : vector<8x128xf32>
    %cst_13 = arith.constant 0.00999999977 : f32
    %18 = vector.broadcast %cst_13 : f32 to vector<8x128xf32>
    %19 = arith.mulf %18, %17 : vector<8x128xf32>
    %20 = arith.maximumf %17, %19 : vector<8x128xf32>
    %21 = arith.truncf %20 : vector<8x128xf32> to vector<8x128xbf16>
    %c1 = arith.constant 1 : index
    %c0_14 = arith.constant 0 : index
    %c0_15 = arith.constant 0 : index
    %22 = vector.load %arg4[%c1, %c0_14, %c0_15] : memref<2x128x128xbf16, #tpu.memory_space<vmem>>, vector<1x128x128xbf16>
    %23 = vector.shape_cast %22 : vector<1x128x128xbf16> to vector<128x128xbf16>
    %cst_16 = arith.constant dense<0.000000e+00> : vector<8x128xf32>
    %24 = tpu.matmul %21, %23, %cst_16 {dimension_numbers = #tpu.dot_dimension_numbers<[1], [0], [0], [1], [0, 0, 1, 1], [], []>} : vector<8x128xbf16>, vector<128x128xbf16>, vector<8x128xf32> -> vector<8x128xf32>
    %c1_17 = arith.constant 1 : index
    %c0_18 = arith.constant 0 : index
    %c0_19 = arith.constant 0 : index
    %25 = vector.load %arg5[%c1_17, %c0_18, %c0_19] : memref<2x1x128xf32, #tpu.memory_space<vmem>>, vector<1x1x128xf32>
    %26 = vector.shape_cast %25 : vector<1x1x128xf32> to vector<1x128xf32>
    %27 = vector.broadcast %26 : vector<1x128xf32> to vector<8x128xf32>
    %28 = arith.addf %24, %27 : vector<8x128xf32>
    %cst_20 = arith.constant 0.00999999977 : f32
    %29 = vector.broadcast %cst_20 : f32 to vector<8x128xf32>
    %30 = arith.mulf %29, %28 : vector<8x128xf32>
    %31 = arith.maximumf %28, %30 : vector<8x128xf32>
    %32 = arith.truncf %31 : vector<8x128xf32> to vector<8x128xbf16>
    %c0_21 = arith.constant 0 : index
    %c0_22 = arith.constant 0 : index
    %33 = vector.load %arg6[%c0_21, %c0_22] : memref<128x128xbf16, #tpu.memory_space<vmem>>, vector<128x128xbf16>
    %cst_23 = arith.constant dense<0.000000e+00> : vector<8x128xf32>
    %34 = tpu.matmul %32, %33, %cst_23 {dimension_numbers = #tpu.dot_dimension_numbers<[1], [0], [0], [1], [0, 0, 1, 1], [], []>} : vector<8x128xbf16>, vector<128x128xbf16>, vector<8x128xf32> -> vector<8x128xf32>
    %c0_24 = arith.constant 0 : index
    %c0_25 = arith.constant 0 : index
    %35 = vector.load %arg7[%c0_24, %c0_25] : memref<1x128xf32, #tpu.memory_space<vmem>>, vector<1x128xf32>
    %36 = vector.broadcast %35 : vector<1x128xf32> to vector<8x128xf32>
    %37 = arith.addf %34, %36 : vector<8x128xf32>
    %cst_26 = arith.constant 0.000000e+00 : f32
    %38 = vector.broadcast %cst_26 : f32 to vector<8x128xf32>
    %39 = arith.subf %38, %37 : vector<8x128xf32>
    %40 = math.exp %39 : vector<8x128xf32>
    %cst_27 = arith.constant 1.000000e+00 : f32
    %41 = vector.broadcast %cst_27 : f32 to vector<8x128xf32>
    %42 = arith.addf %41, %40 : vector<8x128xf32>
    %43 = tpu.reciprocal %42 {approx = true} : vector<8x128xf32> -> vector<8x128xf32>
    %c0_28 = arith.constant 0 : index
    %c0_29 = arith.constant 0 : index
    %44 = vector.load %arg8[%c0_28, %c0_29] : memref<8x128xf32, #tpu.memory_space<vmem>>, vector<8x128xf32>
    tpu.vector_store %arg8[%c0_28, %c0_29], %43 {strides = array<i32>} : memref<8x128xf32, #tpu.memory_space<vmem>>, vector<8x128xf32>,
    return
  }
  func.func @transform_0(%arg0: i32) -> (i32, i32) {
    %c0_i32 = arith.constant 0 : i32
    %c0_i32_0 = arith.constant 0 : i32
    return %arg0, %c0_i32 : i32, i32
  }
  func.func @transform_1(%arg0: i32) -> (i32, i32) {
    %c0_i32 = arith.constant 0 : i32
    %c0_i32_0 = arith.constant 0 : i32
    %c0_i32_1 = arith.constant 0 : i32
    return %c0_i32, %c0_i32_0 : i32, i32
  }
  func.func @transform_2(%arg0: i32) -> (i32, i32) {
    %c0_i32 = arith.constant 0 : i32
    %c0_i32_0 = arith.constant 0 : i32
    %c0_i32_1 = arith.constant 0 : i32
    return %c0_i32, %c0_i32_0 : i32, i32
  }
  func.func @transform_3(%arg0: i32) -> (i32, i32, i32) {
    %c0_i32 = arith.constant 0 : i32
    %c0_i32_0 = arith.constant 0 : i32
    %c0_i32_1 = arith.constant 0 : i32
    %c0_i32_2 = arith.constant 0 : i32
    return %c0_i32, %c0_i32_0, %c0_i32_1 : i32, i32, i32
  }
  func.func @transform_4(%arg0: i32) -> (i32, i32, i32) {
    %c0_i32 = arith.constant 0 : i32
    %c0_i32_0 = arith.constant 0 : i32
    %c0_i32_1 = arith.constant 0 : i32
    %c0_i32_2 = arith.constant 0 : i32
    return %c0_i32, %c0_i32_0, %c0_i32_1 : i32, i32, i32
  }
  func.func @transform_5(%arg0: i32) -> (i32, i32) {
    %c0_i32 = arith.constant 0 : i32
    %c0_i32_0 = arith.constant 0 : i32
    %c0_i32_1 = arith.constant 0 : i32
    return %c0_i32, %c0_i32_0 : i32, i32
  }
  func.func @transform_6(%arg0: i32) -> (i32, i32) {
    %c0_i32 = arith.constant 0 : i32
    %c0_i32_0 = arith.constant 0 : i32
    %c0_i32_1 = arith.constant 0 : i32
    return %c0_i32, %c0_i32_0 : i32, i32
  }
  func.func @transform_7(%arg0: i32) -> (i32, i32) {
    %c0_i32 = arith.constant 0 : i32
    %c0_i32_0 = arith.constant 0 : i32
    return %arg0, %c0_i32 : i32, i32
  }
}

module attributes {stable_mosaic.version = 11 : i64} {
  func.func @_mlp_kernel(%arg0: i32, %arg1: memref<8x128xf32, #tpu.memory_space<vmem>>, %arg2: memref<128x128xbf16, #tpu.memory_space<vmem>>, %arg3: memref<1x128xf32, #tpu.memory_space<vmem>>, %arg4: memref<2x128x128xbf16, #tpu.memory_space<vmem>>, %arg5: memref<2x1x128xf32, #tpu.memory_space<vmem>>, %arg6: memref<128x128xbf16, #tpu.memory_space<vmem>>, %arg7: memref<1x128xf32, #tpu.memory_space<vmem>>, %arg8: memref<8x128xf32, #tpu.memory_space<vmem>>) attributes {dimension_semantics = [#tpu.dimension_semantics<parallel>], iteration_bounds = array<i64: 1>, scalar_prefetch = 0 : i64, scratch_operands = 0 : i64, tpu.core_type = #tpu.core_type<tc>, window_params = [{transform_indices = @transform_0, window_bounds = array<i64: 8, 128>}, {pipeline_mode = #tpu.pipeline_mode<synchronous>, transform_indices = @transform_1, window_bounds = array<i64: 128, 128>}, {pipeline_mode = #tpu.pipeline_mode<synchronous>, transform_indices = @transform_2, window_bounds = array<i64: 1, 128>}, {pipeline_mode = #tpu.pipeline_mode<synchronous>, transform_indices = @transform_3, window_bounds = array<i64: 2, 128, 128>}, {pipeline_mode = #tpu.pipeline_mode<synchronous>, transform_indices = @transform_4, window_bounds = array<i64: 2, 1, 128>}, {pipeline_mode = #tpu.pipeline_mode<synchronous>, transform_indices = @transform_5, window_bounds = array<i64: 128, 128>}, {pipeline_mode = #tpu.pipeline_mode<synchronous>, transform_indices = @transform_6, window_bounds = array<i64: 1, 128>}, {transform_indices = @transform_7, window_bounds = array<i64: 8, 128>}]} {
    %c0 = arith.constant 0 : index
    %c0_0 = arith.constant 0 : index
    %0 = vector.load %arg1[%c0, %c0_0] : memref<8x128xf32, #tpu.memory_space<vmem>>, vector<8x128xf32>
    %1 = arith.truncf %0 : vector<8x128xf32> to vector<8x128xbf16>
    %c0_1 = arith.constant 0 : index
    %c0_2 = arith.constant 0 : index
    %2 = vector.load %arg2[%c0_1, %c0_2] : memref<128x128xbf16, #tpu.memory_space<vmem>>, vector<128x128xbf16>
    %cst = arith.constant dense<0.000000e+00> : vector<8x128xf32>
    %3 = tpu.matmul %1, %2, %cst {dimension_numbers = #tpu.dot_dimension_numbers<[1], [0], [0], [1], [0, 0, 1, 1], [], []>} : vector<8x128xbf16>, vector<128x128xbf16>, vector<8x128xf32> -> vector<8x128xf32>
    %c0_3 = arith.constant 0 : index
    %c0_4 = arith.constant 0 : index
    %4 = vector.load %arg3[%c0_3, %c0_4] : memref<1x128xf32, #tpu.memory_space<vmem>>, vector<1x128xf32>
    %5 = vector.broadcast %4 : vector<1x128xf32> to vector<8x128xf32>
    %6 = arith.addf %3, %5 : vector<8x128xf32>
    %cst_5 = arith.constant 0.00999999977 : f32
    %7 = vector.broadcast %cst_5 : f32 to vector<8x128xf32>
    %8 = arith.mulf %7, %6 : vector<8x128xf32>
    %9 = arith.maximumf %6, %8 : vector<8x128xf32>
    %10 = arith.truncf %9 : vector<8x128xf32> to vector<8x128xbf16>
    %c0_6 = arith.constant 0 : index
    %c0_7 = arith.constant 0 : index
    %c0_8 = arith.constant 0 : index
    %11 = vector.load %arg4[%c0_6, %c0_7, %c0_8] : memref<2x128x128xbf16, #tpu.memory_space<vmem>>, vector<1x128x128xbf16>
    %12 = vector.shape_cast %11 : vector<1x128x128xbf16> to vector<128x128xbf16>
    %cst_9 = arith.constant dense<0.000000e+00> : vector<8x128xf32>
    %13 = tpu.matmul %10, %12, %cst_9 {dimension_numbers = #tpu.dot_dimension_numbers<[1], [0], [0], [1], [0, 0, 1, 1], [], []>} : vector<8x128xbf16>, vector<128x128xbf16>, vector<8x128xf32> -> vector<8x128xf32>
    %c0_10 = arith.constant 0 : index
    %c0_11 = arith.constant 0 : index
    %c0_12 = arith.constant 0 : index
    %14 = vector.load %arg5[%c0_10, %c0_11, %c0_12] : memref<2x1x128xf32, #tpu.memory_space<vmem>>, vector<1x1x128xf32>
    %15 = vector.shape_cast %14 : vector<1x1x128xf32> to vector<1x128xf32>
    %16 = vector.broadcast %15 : vector<1x128xf32> to vector<8x128xf32>
    %17 = arith.addf %13, %16 : vector<8x128xf32>
    %cst_13 = arith.constant 0.00999999977 : f32
    %18 = vector.broadcast %cst_13 : f32 to vector<8x128xf32>
    %19 = arith.mulf %18, %17 : vector<8x128xf32>
    %20 = arith.maximumf %17, %19 : vector<8x128xf32>
    %21 = arith.truncf %20 : vector<8x128xf32> to vector<8x128xbf16>
    %c1 = arith.constant 1 : index
    %c0_14 = arith.constant 0 : index
    %c0_15 = arith.constant 0 : index
    %22 = vector.load %arg4[%c1, %c0_14, %c0_15] : memref<2x128x128xbf16, #tpu.memory_space<vmem>>, vector<1x128x128xbf16>
    %23 = vector.shape_cast %22 : vector<1x128x128xbf16> to vector<128x128xbf16>
    %cst_16 = arith.constant dense<0.000000e+00> : vector<8x128xf32>
    %24 = tpu.matmul %21, %23, %cst_16 {dimension_numbers = #tpu.dot_dimension_numbers<[1], [0], [0], [1], [0, 0, 1, 1], [], []>} : vector<8x128xbf16>, vector<128x128xbf16>, vector<8x128xf32> -> vector<8x128xf32>
    %c1_17 = arith.constant 1 : index
    %c0_18 = arith.constant 0 : index
    %c0_19 = arith.constant 0 : index
    %25 = vector.load %arg5[%c1_17, %c0_18, %c0_19] : memref<2x1x128xf32, #tpu.memory_space<vmem>>, vector<1x1x128xf32>
    %26 = vector.shape_cast %25 : vector<1x1x128xf32> to vector<1x128xf32>
    %27 = vector.broadcast %26 : vector<1x128xf32> to vector<8x128xf32>
    %28 = arith.addf %24, %27 : vector<8x128xf32>
    %cst_20 = arith.constant 0.00999999977 : f32
    %29 = vector.broadcast %cst_20 : f32 to vector<8x128xf32>
    %30 = arith.mulf %29, %28 : vector<8x128xf32>
    %31 = arith.maximumf %28, %30 : vector<8x128xf32>
    %32 = arith.truncf %31 : vector<8x128xf32> to vector<8x128xbf16>
    %c0_21 = arith.constant 0 : index
    %c0_22 = arith.constant 0 : index
    %33 = vector.load %arg6[%c0_21, %c0_22] : memref<128x128xbf16, #tpu.memory_space<vmem>>, vector<128x128xbf16>
    %cst_23 = arith.constant dense<0.000000e+00> : vector<8x128xf32>
    %34 = tpu.matmul %32, %33, %cst_23 {dimension_numbers = #tpu.dot_dimension_numbers<[1], [0], [0], [1], [0, 0, 1, 1], [], []>} : vector<8x128xbf16>, vector<128x128xbf16>, vector<8x128xf32> -> vector<8x128xf32>
    %c0_24 = arith.constant 0 : index
    %c0_25 = arith.constant 0 : index
    %35 = vector.load %arg7[%c0_24, %c0_25] : memref<1x128xf32, #tpu.memory_space<vmem>>, vector<1x128xf32>
    %36 = vector.broadcast %35 : vector<1x128xf32> to vector<8x128xf32>
    %37 = arith.addf %34, %36 : vector<8x128xf32>
    %cst_26 = arith.constant 0.000000e+00 : f32
    %38 = vector.broadcast %cst_26 : f32 to vector<8x128xf32>
    %39 = arith.subf %38, %37 : vector<8x128xf32>
    %40 = math.exp %39 : vector<8x128xf32>
    %cst_27 = arith.constant 1.000000e+00 : f32
    %41 = vector.broadcast %cst_27 : f32 to vector<8x128xf32>
    %42 = arith.addf %41, %40 : vector<8x128xf32>
    %43 = tpu.reciprocal %42 {approx = true} : vector<8x128xf32> -> vector<8x128xf32>
    %c0_28 = arith.constant 0 : index
    %c0_29 = arith.constant 0 : index
    %44 = vector.load %arg8[%c0_28, %c0_29] : memref<8x128xf32, #tpu.memory_space<vmem>>, vector<8x128xf32>
    tpu.vector_store %arg8[%c0_28, %c0_29], %43 {strides = array<i32>} : memref<8x128xf32, #tpu.memory_space<vmem>>, vector<8x128xf32>,
    return
  }
  func.func @transform_0(%arg0: i32) -> (i32, i32) {
    %c0_i32 = arith.constant 0 : i32
    %c0_i32_0 = arith.constant 0 : i32
    return %arg0, %c0_i32 : i32, i32
  }
  func.func @transform_1(%arg0: i32) -> (i32, i32) {
    %c0_i32 = arith.constant 0 : i32
    %c0_i32_0 = arith.constant 0 : i32
    %c0_i32_1 = arith.constant 0 : i32
    return %c0_i32, %c0_i32_0 : i32, i32
  }
  func.func @transform_2(%arg0: i32) -> (i32, i32) {
    %c0_i32 = arith.constant 0 : i32
    %c0_i32_0 = arith.constant 0 : i32
    %c0_i32_1 = arith.constant 0 : i32
    return %c0_i32, %c0_i32_0 : i32, i32
  }
  func.func @transform_3(%arg0: i32) -> (i32, i32, i32) {
    %c0_i32 = arith.constant 0 : i32
    %c0_i32_0 = arith.constant 0 : i32
    %c0_i32_1 = arith.constant 0 : i32
    %c0_i32_2 = arith.constant 0 : i32
    return %c0_i32, %c0_i32_0, %c0_i32_1 : i32, i32, i32
  }
  func.func @transform_4(%arg0: i32) -> (i32, i32, i32) {
    %c0_i32 = arith.constant 0 : i32
    %c0_i32_0 = arith.constant 0 : i32
    %c0_i32_1 = arith.constant 0 : i32
    %c0_i32_2 = arith.constant 0 : i32
    return %c0_i32, %c0_i32_0, %c0_i32_1 : i32, i32, i32
  }
  func.func @transform_5(%arg0: i32) -> (i32, i32) {
    %c0_i32 = arith.constant 0 : i32
    %c0_i32_0 = arith.constant 0 : i32
    %c0_i32_1 = arith.constant 0 : i32
    return %c0_i32, %c0_i32_0 : i32, i32
  }
  func.func @transform_6(%arg0: i32) -> (i32, i32) {
    %c0_i32 = arith.constant 0 : i32
    %c0_i32_0 = arith.constant 0 : i32
    %c0_i32_1 = arith.constant 0 : i32
    return %c0_i32, %c0_i32_0 : i32, i32
  }
  func.func @transform_7(%arg0: i32) -> (i32, i32) {
    %c0_i32 = arith.constant 0 : i32
    %c0_i32_0 = arith.constant 0 : i32
    return %arg0, %c0_i32 : i32, i32
  }
}

</mosaic_0001>

<bundles_post_ra>
// kernel: tpu_custom_call.1
= control target key start
LH: loop header
LB: loop body
LE: loop exit
PB: predicated region body
PF: predicated region fallthrough
CT: control target
= control target key end

     0   :  { %12 = vsyncpa [#allocation3], 0  ;;  %s828_s0 = inlined_call_operand.hbm [shape: f32[8,128], index: 0, kind: input, shape index: {}]   ;;  %s829_s1 = inlined_call_operand.hbm [shape: bf16[128,128], index: 1, kind: input, shape index: {}]   ;;  %s830_s2 = inlined_call_operand.vmem [shape: f32[1,128], index: 2, kind: input, shape index: {}]   ;;  %s831_s3 = inlined_call_operand.hbm [shape: bf16[2,128,128], index: 3, kind: input, shape index: {}]   ;;  %s832_s4 = inlined_call_operand.vmem [shape: f32[2,1,128], index: 4, kind: input, shape index: {}]   ;;  %s833_s5 = inlined_call_operand.hbm [shape: bf16[128,128], index: 5, kind: input, shape index: {}]   ;;  %s834_s6 = inlined_call_operand.vmem [shape: f32[1,128], index: 6, kind: input, shape index: {}]   ;;  %s835_s7 = inlined_call_operand.hbm [shape: f32[8,128], index: 7, kind: output, shape index: {}]  }
   0x1   :  { %13 = vsyncpa [#allocation6], 0 }
   0x2   :  { %14 = vsyncpa [#allocation9], 0  ;;  %s31_s26 = sshll.u32 %s829_s1, 4  ;;  %s32_s26 = int_to_ptr.hbm [resolvable:$true] %s31_s26 }
   0x3   :  { %15 = vsyncpa [#allocation4], 0  ;;  %s754_s27 = smov [#allocation5]   ;;  %s21_s8 = sshll.u32 %s828_s0, 4  ;;  %s22_s8 = int_to_ptr.hbm [resolvable:$true] %s21_s8 }
   0x4   :  { %s33_s28 = sshll.u32 %s754_s27, 4  ;;  %s755_s9 = smov 64   ;;  %s34_s28 = int_to_ptr.vmem [resolvable:$true] %s33_s28 }
   0x5   :  { %s756_s10 = smov 4   ;;  %s757_s11 = smov [#allocation2]  }
   0x6   :  { %39 = dma.hbm_to_vmem [thread:$0]  %s32_s26, 1024, %s34_s28, [#allocation6], %s755_s9, %s755_s9, %s756_s10  }
   0x7   :  { %s23_s12 = sshll.u32 %s757_s11, 4  ;;  %s46_s15 = sshll.u32 %s831_s3, 4  ;;  %s24_s12 = int_to_ptr.vmem [resolvable:$true] %s23_s12  ;;  %s47_s15 = int_to_ptr.hbm [resolvable:$true] %s46_s15 }
   0x8   :  { %26 = dma.hbm_to_vmem [thread:$0]  %s22_s8, 128, %s24_s12, [#allocation3]  }
   0x9   :  { %s61_s17 = sshll.u32 %s833_s5, 4  ;;  %s758_s18 = smov [#allocation7]   ;;  %s62_s17 = int_to_ptr.hbm [resolvable:$true] %s61_s17 }
   0xa   :  { %s48_s19 = sshll.u32 %s758_s18, 4  ;;  %s759_s0 = smov [#allocation8]   ;;  %s49_s19 = int_to_ptr.vmem [resolvable:$true] %s48_s19 }
   0xb   :  { %54 = dma.hbm_to_vmem [thread:$0]  %s47_s15, 2048, %s49_s19, [#allocation6], %s755_s9, %s755_s9, %s756_s10  }
   0xc   :  { %s63_s20 = sshll.u32 %s759_s0, 4  ;;  %s64_s20 = int_to_ptr.vmem [resolvable:$true] %s63_s20 }
   0xd   :  { %69 = dma.hbm_to_vmem [thread:$0]  %s62_s17, 1024, %s64_s20, [#allocation9], %s755_s9, %s755_s9, %s756_s10  }
   0xe   :  { %746 = dma.done.wait [#allocation3], 128  }
   0xf   :  { %747 = vsyncadd [#allocation3], 4294967168 }
  0x10   :  { %748 = dma.done.wait [#allocation6], 3072  }
  0x11   :  { %749 = vsyncadd [#allocation6], 4294964224 }
  0x12   :  { %750 = dma.done.wait [#allocation9], 1024  }
  0x13   :  { %751 = vsyncadd [#allocation9], 4294966272  ;;  %v586_v0 = vld [vmem:[#allocation5 + $0x38] sm:$0xff]  ;;  %v585_v1 = vld [vmem:[#allocation5 + $0x30] sm:$0xff]  ;;  %s438_s29 = sshll.u32 %s835_s7, 4  ;;  %s439_s29 = int_to_ptr.hbm [resolvable:$true] %s438_s29 }
  0x14   :  { %158 = vmatpush.bf16.msra.mxu0 %v586_v0  ;;  %v594_v2 = vld [vmem:[#allocation7 + $0x38] sm:$0xff]  ;;  %v593_v3 = vld [vmem:[#allocation7 + $0x30] sm:$0xff]  ;;  %v584_v4 = vld [vmem:[#allocation5 + $0x28] sm:$0xff] }
  0x15   :  { %242 = vmatpush.bf16.msra.mxu1 %v594_v2  ;;  %v592_v5 = vld [vmem:[#allocation7 + $0x28] sm:$0xff]  ;;  %v583_v6 = vld [vmem:[#allocation5 + $0x20] sm:$0xff]  ;;  %v582_v8 = vld [vmem:[#allocation5 + $0x18] sm:$0xff] }
  0x16   :  { %v591_v7 = vld [vmem:[#allocation7 + $0x20] sm:$0xff]  ;;  %v590_v9 = vld [vmem:[#allocation7 + $0x18] sm:$0xff]  ;;  %v581_v10 = vld [vmem:[#allocation5 + $0x10] sm:$0xff] }
  0x17   :  { %v589_v11 = vld [vmem:[#allocation7 + $0x10] sm:$0xff]  ;;  %v580_v12 = vld [vmem:[#allocation5 + $0x8] sm:$0xff]  ;;  %v579_v13 = vld [vmem:[#allocation5] sm:$0xff] }
  0x18   :  { %159 = vmatpush.bf16.msra.mxu0 %v585_v1  ;;  %v88_v14 = vld [vmem:[#allocation2] sm:$0xff]  ;;  %v588_v16 = vld [vmem:[#allocation7 + $0x8] sm:$0xff]  ;;  %v587_v17 = vld [vmem:[#allocation7] sm:$0xff] }
  0x19   :  { %243 = vmatpush.bf16.msra.mxu1 %v593_v3  ;;  %v89_v15 = vpack.c.bf16 %v88_v14, %v88_v14  ;;  %v602_v18 = vld [vmem:[#allocation7 + $0x78] sm:$0xff]  ;;  %v601_v19 = vld [vmem:[#allocation7 + $0x70] sm:$0xff]  ;;  %v600_v20 = vld [vmem:[#allocation7 + $0x68] sm:$0xff] }
  0x1a   :  { %328 = vmatpush.bf16.msra.mxu2 %v602_v18  ;;  %v599_v21 = vld [vmem:[#allocation7 + $0x60] sm:$0xff]  ;;  %v598_v22 = vld [vmem:[#allocation7 + $0x58] sm:$0xff]  ;;  %v597_v23 = vld [vmem:[#allocation7 + $0x50] sm:$0xff] }
  0x1b   :  { %v618_v24 = vld [vmem:[%s830_s2] ss:$0 sm:$0xff]  ;;  %v596_v31 = vld [vmem:[#allocation7 + $0x48] sm:$0xff]  ;;  %v595_v32 = vld [vmem:[#allocation7 + $0x40] sm:$0xff] }
  0x1c   :  { %160 = vmatpush.bf16.msra.mxu0 %v584_v4  ;;  %v610_v33 = vld [vmem:[#allocation8 + $0x38] sm:$0xff]  ;;  %v609_v34 = vld [vmem:[#allocation8 + $0x30] sm:$0xff]  ;;  %v608_v35 = vld [vmem:[#allocation8 + $0x28] sm:$0xff] }
  0x1d   :  { %244 = vmatpush.bf16.msra.mxu1 %v592_v5  ;;  %412 = vmatpush.bf16.msra.mxu3 %v610_v33  ;;  %v607_v36 = vld [vmem:[#allocation8 + $0x20] sm:$0xff]  ;;  %v606_v37 = vld [vmem:[#allocation8 + $0x18] sm:$0xff]  ;;  %v605_v38 = vld [vmem:[#allocation8 + $0x10] sm:$0xff] }
  0x1e   :  { %329 = vmatpush.bf16.msra.mxu2 %v601_v19  ;;  %v619_v39 = vld [vmem:[%s832_s4] ss:$0 sm:$0xff]  ;;  %v604_v46 = vld [vmem:[#allocation8 + $0x8] sm:$0xff]  ;;  %v603_v47 = vld [vmem:[#allocation8] sm:$0xff] }
  0x1f   :  { %v620_v48 = vld [vmem:[%s832_s4 + $0x1] ss:$0 sm:$0xff]  ;;  %v621_v55 = vld [vmem:[%s834_s6] ss:$0 sm:$0xff]  ;;  %s760_s4 = smov [#allocation10]  }
  0x20   :  { %161 = vmatpush.bf16.msra.mxu0 %v583_v6  ;;  %s436_s26 = sshll.u32 %s760_s4, 4  ;;  %s437_s26 = int_to_ptr.vmem [resolvable:$true] %s436_s26 }
  0x21   :  { %245 = vmatpush.bf16.msra.mxu1 %v591_v7  ;;  %413 = vmatpush.bf16.msra.mxu3 %v609_v34 }
  0x22   :  { %330 = vmatpush.bf16.msra.mxu2 %v600_v20 }
  0x24   :  { %162 = vmatpush.bf16.msra.mxu0 %v582_v8 }
  0x25   :  { %246 = vmatpush.bf16.msra.mxu1 %v590_v9  ;;  %414 = vmatpush.bf16.msra.mxu3 %v608_v35 }
  0x26   :  { %331 = vmatpush.bf16.msra.mxu2 %v599_v21 }
  0x28   :  { %163 = vmatpush.bf16.msra.mxu0 %v581_v10 }
  0x29   :  { %247 = vmatpush.bf16.msra.mxu1 %v589_v11  ;;  %415 = vmatpush.bf16.msra.mxu3 %v607_v36 }
  0x2a   :  { %332 = vmatpush.bf16.msra.mxu2 %v598_v22 }
  0x2c   :  { %164 = vmatpush.bf16.msra.mxu0 %v580_v12 }
  0x2d   :  { %248 = vmatpush.bf16.msra.mxu1 %v588_v16  ;;  %416 = vmatpush.bf16.msra.mxu3 %v606_v37 }
  0x2e   :  { %333 = vmatpush.bf16.msra.mxu2 %v597_v23 }
  0x30   :  { %165 = vmatpush.bf16.msra.mxu0 %v579_v13 }
  0x31   :  { %249 = vmatpush.bf16.msra.mxu1 %v587_v17  ;;  %417 = vmatpush.bf16.msra.mxu3 %v605_v38 }
  0x32   :  { %334 = vmatpush.bf16.msra.mxu2 %v596_v31 }
  0x33   :  { %166 = vmatmul.bf16.vlgmr.msra.gmra.mxu0 %v89_v15 }
  0x35   :  { %418 = vmatpush.bf16.msra.mxu3 %v604_v46 }
  0x36   :  { %335 = vmatpush.bf16.msra.mxu2 %v595_v32 }
  0x39   :  { %419 = vmatpush.bf16.msra.mxu3 %v603_v47 }
  0xb0   :  { %v167_v25 = vpop.f32.mrf.mxu0 }
  0xb1   :  { %v168_v26 = vadd.f32 %v618_v24, %v167_v25 }
  0xb3   :  { %v171_v27 = vmul.f32 0.01, %v168_v26 }
  0xb5   :  { %v172_v28 = vmax.f32 %v168_v26, %v171_v27 }
  0xb7   :  { %v173_v29 = vpack.c.bf16 %v172_v28, %v172_v28 }
  0xb8   :  { %v169_v30 = vpop.f32.mrf.mxu0 }
  0xb9   :  { %250 = vmatmul.bf16.vlgmr.msra.gmra.mxu1 %v173_v29 }
 0x136   :  { %v251_v40 = vpop.f32.mrf.mxu1 }
 0x137   :  { %v252_v41 = vadd.f32 %v619_v39, %v251_v40 }
 0x139   :  { %v255_v42 = vmul.f32 0.01, %v252_v41 }
 0x13b   :  { %v256_v43 = vmax.f32 %v252_v41, %v255_v42 }
 0x13d   :  { %v257_v44 = vpack.c.bf16 %v256_v43, %v256_v43 }
 0x13e   :  { %v253_v45 = vpop.f32.mrf.mxu1 }
 0x13f   :  { %336 = vmatmul.bf16.vlgmr.msra.gmra.mxu2 %v257_v44 }
 0x1c2   :  { %v337_v49 = vpop.f32.mrf.mxu2 }
 0x1c3   :  { %v338_v50 = vadd.f32 %v620_v48, %v337_v49 }
 0x1c5   :  { %v341_v51 = vmul.f32 0.01, %v338_v50 }
 0x1c7   :  { %v342_v52 = vmax.f32 %v338_v50, %v341_v51 }
 0x1c9   :  { %v343_v53 = vpack.c.bf16 %v342_v52, %v342_v52 }
 0x1ca   :  { %v339_v54 = vpop.f32.mrf.mxu2 }
 0x1cb   :  { %420 = vmatmul.bf16.vlgmr.msra.gmra.mxu3 %v343_v53 }
 0x24e   :  { %v421_v56 = vpop.f32.mrf.mxu3 }
 0x24f   :  { %v422_v57 = vadd.f32 %v621_v55, %v421_v56 }
 0x251   :  { %v425_v58 = vsub.f32 0.0, %v422_v57 }
 0x253   :  { %v426_v59 = vmul.f32 1.442695, %v425_v58 }
 0x255   :  { %622 = vpow2.f32 %v426_v59 }
 0x256   :  { %v423_v60 = vpop.f32.mrf.mxu3 }
 0x25b   :  { %v623_v61 = vpop.eup %622 }
 0x25c   :  { %v428_v62 = vadd.f32 1.0, %v623_v61 }
 0x25e   :  { %624 = vrcp.f32 %v428_v62 }
 0x264   :  { %v625_v63 = vpop.eup %624 }
 0x265   :  { %430 = vst [vmem:[#allocation10] sm:$0xff] %v625_v63 }
 0x266   :  { %441 = dma.vmem_to_hbm [thread:$0]  %s437_s26, 128, %s439_s29, [#allocation4]  }
 0x267   :  { %752 = dma.done.wait [#allocation4], 128  }
 0x268   :  { %753 = vsyncadd [#allocation4], 4294967168 }
 0x269   :  { %446 = vsyncpa [#allocation3], 1 }
 0x26a   :  { %447 = vsyncpa [#allocation6], 1 }
 0x26b   :  { %448 = vsyncpa [#allocation9], 1 }
 0x26c   :  { %449 = vsyncpa [#allocation4], 1 }

// kernel: tpu_custom_call.1
= control target key start
LH: loop header
LB: loop body
LE: loop exit
PB: predicated region body
PF: predicated region fallthrough
CT: control target
= control target key end

     0   :  { %12 = vsyncpa [#allocation3], 0  ;;  %s828_s0 = inlined_call_operand.hbm [shape: f32[8,128], index: 0, kind: input, shape index: {}]   ;;  %s829_s1 = inlined_call_operand.hbm [shape: bf16[128,128], index: 1, kind: input, shape index: {}]   ;;  %s830_s2 = inlined_call_operand.vmem [shape: f32[1,128], index: 2, kind: input, shape index: {}]   ;;  %s831_s3 = inlined_call_operand.hbm [shape: bf16[2,128,128], index: 3, kind: input, shape index: {}]   ;;  %s832_s4 = inlined_call_operand.vmem [shape: f32[2,1,128], index: 4, kind: input, shape index: {}]   ;;  %s833_s5 = inlined_call_operand.hbm [shape: bf16[128,128], index: 5, kind: input, shape index: {}]   ;;  %s834_s6 = inlined_call_operand.vmem [shape: f32[1,128], index: 6, kind: input, shape index: {}]   ;;  %s835_s7 = inlined_call_operand.hbm [shape: f32[8,128], index: 7, kind: output, shape index: {}]  }
   0x1   :  { %13 = vsyncpa [#allocation6], 0 }
   0x2   :  { %14 = vsyncpa [#allocation9], 0  ;;  %s31_s26 = sshll.u32 %s829_s1, 4  ;;  %s32_s26 = int_to_ptr.hbm [resolvable:$true] %s31_s26 }
   0x3   :  { %15 = vsyncpa [#allocation4], 0  ;;  %s754_s27 = smov [#allocation5]   ;;  %s21_s8 = sshll.u32 %s828_s0, 4  ;;  %s22_s8 = int_to_ptr.hbm [resolvable:$true] %s21_s8 }
   0x4   :  { %s33_s28 = sshll.u32 %s754_s27, 4  ;;  %s755_s9 = smov 64   ;;  %s34_s28 = int_to_ptr.vmem [resolvable:$true] %s33_s28 }
   0x5   :  { %s756_s10 = smov 4   ;;  %s757_s11 = smov [#allocation2]  }
   0x6   :  { %39 = dma.hbm_to_vmem [thread:$0]  %s32_s26, 1024, %s34_s28, [#allocation6], %s755_s9, %s755_s9, %s756_s10  }
   0x7   :  { %s23_s12 = sshll.u32 %s757_s11, 4  ;;  %s46_s15 = sshll.u32 %s831_s3, 4  ;;  %s24_s12 = int_to_ptr.vmem [resolvable:$true] %s23_s12  ;;  %s47_s15 = int_to_ptr.hbm [resolvable:$true] %s46_s15 }
   0x8   :  { %26 = dma.hbm_to_vmem [thread:$0]  %s22_s8, 128, %s24_s12, [#allocation3]  }
   0x9   :  { %s61_s17 = sshll.u32 %s833_s5, 4  ;;  %s758_s18 = smov [#allocation7]   ;;  %s62_s17 = int_to_ptr.hbm [resolvable:$true] %s61_s17 }
   0xa   :  { %s48_s19 = sshll.u32 %s758_s18, 4  ;;  %s759_s0 = smov [#allocation8]   ;;  %s49_s19 = int_to_ptr.vmem [resolvable:$true] %s48_s19 }
   0xb   :  { %54 = dma.hbm_to_vmem [thread:$0]  %s47_s15, 2048, %s49_s19, [#allocation6], %s755_s9, %s755_s9, %s756_s10  }
   0xc   :  { %s63_s20 = sshll.u32 %s759_s0, 4  ;;  %s64_s20 = int_to_ptr.vmem [resolvable:$true] %s63_s20 }
   0xd   :  { %69 = dma.hbm_to_vmem [thread:$0]  %s62_s17, 1024, %s64_s20, [#allocation9], %s755_s9, %s755_s9, %s756_s10  }
   0xe   :  { %746 = dma.done.wait [#allocation3], 128  }
   0xf   :  { %747 = vsyncadd [#allocation3], 4294967168 }
  0x10   :  { %748 = dma.done.wait [#allocation6], 3072  }
  0x11   :  { %749 = vsyncadd [#allocation6], 4294964224 }
  0x12   :  { %750 = dma.done.wait [#allocation9], 1024  }
  0x13   :  { %751 = vsyncadd [#allocation9], 4294966272  ;;  %v586_v0 = vld [vmem:[#allocation5 + $0x38] sm:$0xff]  ;;  %v585_v1 = vld [vmem:[#allocation5 + $0x30] sm:$0xff]  ;;  %s438_s29 = sshll.u32 %s835_s7, 4  ;;  %s439_s29 = int_to_ptr.hbm [resolvable:$true] %s438_s29 }
  0x14   :  { %158 = vmatpush.bf16.msra.mxu0 %v586_v0  ;;  %v594_v2 = vld [vmem:[#allocation7 + $0x38] sm:$0xff]  ;;  %v593_v3 = vld [vmem:[#allocation7 + $0x30] sm:$0xff]  ;;  %v584_v4 = vld [vmem:[#allocation5 + $0x28] sm:$0xff] }
  0x15   :  { %242 = vmatpush.bf16.msra.mxu1 %v594_v2  ;;  %v592_v5 = vld [vmem:[#allocation7 + $0x28] sm:$0xff]  ;;  %v583_v6 = vld [vmem:[#allocation5 + $0x20] sm:$0xff]  ;;  %v582_v8 = vld [vmem:[#allocation5 + $0x18] sm:$0xff] }
  0x16   :  { %v591_v7 = vld [vmem:[#allocation7 + $0x20] sm:$0xff]  ;;  %v590_v9 = vld [vmem:[#allocation7 + $0x18] sm:$0xff]  ;;  %v581_v10 = vld [vmem:[#allocation5 + $0x10] sm:$0xff] }
  0x17   :  { %v589_v11 = vld [vmem:[#allocation7 + $0x10] sm:$0xff]  ;;  %v580_v12 = vld [vmem:[#allocation5 + $0x8] sm:$0xff]  ;;  %v579_v13 = vld [vmem:[#allocation5] sm:$0xff] }
  0x18   :  { %159 = vmatpush.bf16.msra.mxu0 %v585_v1  ;;  %v88_v14 = vld [vmem:[#allocation2] sm:$0xff]  ;;  %v588_v16 = vld [vmem:[#allocation7 + $0x8] sm:$0xff]  ;;  %v587_v17 = vld [vmem:[#allocation7] sm:$0xff] }
  0x19   :  { %243 = vmatpush.bf16.msra.mxu1 %v593_v3  ;;  %v89_v15 = vpack.c.bf16 %v88_v14, %v88_v14  ;;  %v602_v18 = vld [vmem:[#allocation7 + $0x78] sm:$0xff]  ;;  %v601_v19 = vld [vmem:[#allocation7 + $0x70] sm:$0xff]  ;;  %v600_v20 = vld [vmem:[#allocation7 + $0x68] sm:$0xff] }
  0x1a   :  { %328 = vmatpush.bf16.msra.mxu2 %v602_v18  ;;  %v599_v21 = vld [vmem:[#allocation7 + $0x60] sm:$0xff]  ;;  %v598_v22 = vld [vmem:[#allocation7 + $0x58] sm:$0xff]  ;;  %v597_v23 = vld [vmem:[#allocation7 + $0x50] sm:$0xff] }
  0x1b   :  { %v618_v24 = vld [vmem:[%s830_s2] ss:$0 sm:$0xff]  ;;  %v596_v31 = vld [vmem:[#allocation7 + $0x48] sm:$0xff]  ;;  %v595_v32 = vld [vmem:[#allocation7 + $0x40] sm:$0xff] }
  0x1c   :  { %160 = vmatpush.bf16.msra.mxu0 %v584_v4  ;;  %v610_v33 = vld [vmem:[#allocation8 + $0x38] sm:$0xff]  ;;  %v609_v34 = vld [vmem:[#allocation8 + $0x30] sm:$0xff]  ;;  %v608_v35 = vld [vmem:[#allocation8 + $0x28] sm:$0xff] }
  0x1d   :  { %244 = vmatpush.bf16.msra.mxu1 %v592_v5  ;;  %412 = vmatpush.bf16.msra.mxu3 %v610_v33  ;;  %v607_v36 = vld [vmem:[#allocation8 + $0x20] sm:$0xff]  ;;  %v606_v37 = vld [vmem:[#allocation8 + $0x18] sm:$0xff]  ;;  %v605_v38 = vld [vmem:[#allocation8 + $0x10] sm:$0xff] }
  0x1e   :  { %329 = vmatpush.bf16.msra.mxu2 %v601_v19  ;;  %v619_v39 = vld [vmem:[%s832_s4] ss:$0 sm:$0xff]  ;;  %v604_v46 = vld [vmem:[#allocation8 + $0x8] sm:$0xff]  ;;  %v603_v47 = vld [vmem:[#allocation8] sm:$0xff] }
  0x1f   :  { %v620_v48 = vld [vmem:[%s832_s4 + $0x1] ss:$0 sm:$0xff]  ;;  %v621_v55 = vld [vmem:[%s834_s6] ss:$0 sm:$0xff]  ;;  %s760_s4 = smov [#allocation10]  }
  0x20   :  { %161 = vmatpush.bf16.msra.mxu0 %v583_v6  ;;  %s436_s26 = sshll.u32 %s760_s4, 4  ;;  %s437_s26 = int_to_ptr.vmem [resolvable:$true] %s436_s26 }
  0x21   :  { %245 = vmatpush.bf16.msra.mxu1 %v591_v7  ;;  %413 = vmatpush.bf16.msra.mxu3 %v609_v34 }
  0x22   :  { %330 = vmatpush.bf16.msra.mxu2 %v600_v20 }
  0x24   :  { %162 = vmatpush.bf16.msra.mxu0 %v582_v8 }
  0x25   :  { %246 = vmatpush.bf16.msra.mxu1 %v590_v9  ;;  %414 = vmatpush.bf16.msra.mxu3 %v608_v35 }
  0x26   :  { %331 = vmatpush.bf16.msra.mxu2 %v599_v21 }
  0x28   :  { %163 = vmatpush.bf16.msra.mxu0 %v581_v10 }
  0x29   :  { %247 = vmatpush.bf16.msra.mxu1 %v589_v11  ;;  %415 = vmatpush.bf16.msra.mxu3 %v607_v36 }
  0x2a   :  { %332 = vmatpush.bf16.msra.mxu2 %v598_v22 }
  0x2c   :  { %164 = vmatpush.bf16.msra.mxu0 %v580_v12 }
  0x2d   :  { %248 = vmatpush.bf16.msra.mxu1 %v588_v16  ;;  %416 = vmatpush.bf16.msra.mxu3 %v606_v37 }
  0x2e   :  { %333 = vmatpush.bf16.msra.mxu2 %v597_v23 }
  0x30   :  { %165 = vmatpush.bf16.msra.mxu0 %v579_v13 }
  0x31   :  { %249 = vmatpush.bf16.msra.mxu1 %v587_v17  ;;  %417 = vmatpush.bf16.msra.mxu3 %v605_v38 }
  0x32   :  { %334 = vmatpush.bf16.msra.mxu2 %v596_v31 }
  0x33   :  { %166 = vmatmul.bf16.vlgmr.msra.gmra.mxu0 %v89_v15 }
  0x35   :  { %418 = vmatpush.bf16.msra.mxu3 %v604_v46 }
  0x36   :  { %335 = vmatpush.bf16.msra.mxu2 %v595_v32 }
  0x39   :  { %419 = vmatpush.bf16.msra.mxu3 %v603_v47 }
  0xb0   :  { %v167_v25 = vpop.f32.mrf.mxu0 }
  0xb1   :  { %v168_v26 = vadd.f32 %v618_v24, %v167_v25 }
  0xb3   :  { %v171_v27 = vmul.f32 0.01, %v168_v26 }
  0xb5   :  { %v172_v28 = vmax.f32 %v168_v26, %v171_v27 }
  0xb7   :  { %v173_v29 = vpack.c.bf16 %v172_v28, %v172_v28 }
  0xb8   :  { %v169_v30 = vpop.f32.mrf.mxu0 }
  0xb9   :  { %250 = vmatmul.bf16.vlgmr.msra.gmra.mxu1 %v173_v29 }
 0x136   :  { %v251_v40 = vpop.f32.mrf.mxu1 }
 0x137   :  { %v252_v41 = vadd.f32 %v619_v39, %v251_v40 }
 0x139   :  { %v255_v42 = vmul.f32 0.01, %v252_v41 }
 0x13b   :  { %v256_v43 = vmax.f32 %v252_v41, %v255_v42 }
 0x13d   :  { %v257_v44 = vpack.c.bf16 %v256_v43, %v256_v43 }
 0x13e   :  { %v253_v45 = vpop.f32.mrf.mxu1 }
 0x13f   :  { %336 = vmatmul.bf16.vlgmr.msra.gmra.mxu2 %v257_v44 }
 0x1c2   :  { %v337_v49 = vpop.f32.mrf.mxu2 }
 0x1c3   :  { %v338_v50 = vadd.f32 %v620_v48, %v337_v49 }
 0x1c5   :  { %v341_v51 = vmul.f32 0.01, %v338_v50 }
 0x1c7   :  { %v342_v52 = vmax.f32 %v338_v50, %v341_v51 }
 0x1c9   :  { %v343_v53 = vpack.c.bf16 %v342_v52, %v342_v52 }
 0x1ca   :  { %v339_v54 = vpop.f32.mrf.mxu2 }
 0x1cb   :  { %420 = vmatmul.bf16.vlgmr.msra.gmra.mxu3 %v343_v53 }
 0x24e   :  { %v421_v56 = vpop.f32.mrf.mxu3 }
 0x24f   :  { %v422_v57 = vadd.f32 %v621_v55, %v421_v56 }
 0x251   :  { %v425_v58 = vsub.f32 0.0, %v422_v57 }
 0x253   :  { %v426_v59 = vmul.f32 1.442695, %v425_v58 }
 0x255   :  { %622 = vpow2.f32 %v426_v59 }
 0x256   :  { %v423_v60 = vpop.f32.mrf.mxu3 }
 0x25b   :  { %v623_v61 = vpop.eup %622 }
 0x25c   :  { %v428_v62 = vadd.f32 1.0, %v623_v61 }
 0x25e   :  { %624 = vrcp.f32 %v428_v62 }
 0x264   :  { %v625_v63 = vpop.eup %624 }
 0x265   :  { %430 = vst [vmem:[#allocation10] sm:$0xff] %v625_v63 }
 0x266   :  { %441 = dma.vmem_to_hbm [thread:$0]  %s437_s26, 128, %s439_s29, [#allocation4]  }
 0x267   :  { %752 = dma.done.wait [#allocation4], 128  }
 0x268   :  { %753 = vsyncadd [#allocation4], 4294967168 }
 0x269   :  { %446 = vsyncpa [#allocation3], 1 }
 0x26a   :  { %447 = vsyncpa [#allocation6], 1 }
 0x26b   :  { %448 = vsyncpa [#allocation9], 1 }
 0x26c   :  { %449 = vsyncpa [#allocation4], 1 }

</bundles_post_ra>
